<compile_context>
chip_gen: v5e
topology: v5e:2x2
jax: 0.10.0
libtpu: 0.0.40
codegen_flags: <defaults>
</compile_context>

<pallas_src>
import functools

import jax
import jax.numpy as jnp
import numpy as np
from jax.experimental import pallas as pl
from jax.experimental.pallas import tpu as pltpu


# ---------------------------------------------------------------------------
# Kernel
# ---------------------------------------------------------------------------
def _fuse_kernel(local_ref, global_ref, wl_ref, wg_ref, b_ref, out_ref, *,
                 compute_dtype=None):
    """out = relu(local @ W_l + global @ W_g + b) for one (TB, TN) tile.

    local_ref : (TB, TN, Dl)  VMEM
    global_ref: (TB, Dg)      VMEM
    wl_ref    : (Dl, Df)      VMEM (grid-invariant)
    wg_ref    : (Dg, Df)      VMEM (grid-invariant)
    b_ref     : (1, Df)       VMEM (grid-invariant)
    out_ref   : (TB, TN, Df)  VMEM
    """
    tb, tn, dl = local_ref.shape
    df = out_ref.shape[-1]

    loc = local_ref[...]
    glb = global_ref[...]
    wl = wl_ref[...]
    wg = wg_ref[...]
    if compute_dtype is not None:       # in-kernel cast: no extra HBM traffic
        loc = loc.astype(compute_dtype)
        glb = glb.astype(compute_dtype)
        wl = wl.astype(compute_dtype)
        wg = wg.astype(compute_dtype)

    # TN is a multiple of 8 (wrapper guarantees it), so this collapse is a free
    # relayout and the MXU sees one (TB*TN, Dl) x (Dl, Df) matmul.
    acc = jnp.dot(loc.reshape(tb * tn, dl), wl,
                  preferred_element_type=jnp.float32)          # (TB*TN, Df)
    acc = acc.reshape(tb, tn, df)

    # Small per-tile global projection (+ bias), broadcast over the n axis.
    gproj = jnp.dot(glb, wg, preferred_element_type=jnp.float32)   # (TB, Df)
    gproj = gproj + b_ref[...].astype(jnp.float32)                 # (+ (1, Df))

    acc = acc + gproj[:, None, :]
    out_ref[...] = jnp.maximum(acc, 0.0).astype(out_ref.dtype)


# ---------------------------------------------------------------------------
# Tiling
# ---------------------------------------------------------------------------
_MAX_N_TILE = 2048       # n rows per tile when n is large (multiple of 8)
_TARGET_ROWS = 4096      # ~4K (TB * TN) rows per tile
_MIN_ROW_STEPS = 4       # >= 2 steps per TensorCore on 2-TC chips (v7x)


def _round_up(x, m):
    return ((x + m - 1) // m) * m


def _pick_tiles(bm, n):
    """Returns (tb, tn, padded_bm, padded_n)."""
    # n axis: full n when small (padded to a multiple of 8), else tiled.
    if n <= _MAX_N_TILE:
        tn = _round_up(n, 8)
        padded_n = tn
    else:
        tn = _MAX_N_TILE
        padded_n = _round_up(n, tn)
    n_steps = padded_n // tn

    # row (b*m) axis.
    tb = max(1, _TARGET_ROWS // tn)
    if n_steps < _MIN_ROW_STEPS and bm >= _MIN_ROW_STEPS * 8:
        tb = min(tb, bm // _MIN_ROW_STEPS)   # keep some grid parallelism
    if tb >= bm:
        tb, padded_bm = bm, bm               # single full-row block (any size OK)
    else:
        tb = max(8, (tb // 8) * 8)           # (8,128) rule for the 2-D global block
        padded_bm = _round_up(bm, tb)
    return tb, tn, padded_bm, padded_n


# ---------------------------------------------------------------------------
# Wrapper (one fusion layer == one pallas_call)
# ---------------------------------------------------------------------------
@functools.partial(jax.jit, static_argnames=("compute_dtype", "out_dtype"))
def feature_fuse_pallas(local_feature, global_feature, wl, wg, b, *,
                        compute_dtype=None, out_dtype=None):
    """Equivalent of feature_fuse_1.forward.

    local_feature : (B, n, m*local_dim)
    global_feature: (B, m, global_dim)
    wl            : (local_dim, fuse_dim)   pre-transposed local half of Linear W
    wg            : (global_dim, fuse_dim)  pre-transposed global half of Linear W
    b             : (fuse_dim,)
    returns       : (B*m, n, fuse_dim)
    """
    B, m, global_dim = global_feature.shape
    _, n, mdl = local_feature.shape
    local_dim, fuse_dim = wl.shape
    assert mdl == m * local_dim, (mdl, m, local_dim)
    bm = B * m
    if out_dtype is None:
        out_dtype = local_feature.dtype

    # Glue reshapes (row-major, same element order as torch.reshape; no copy).
    local_r = jnp.reshape(local_feature, (bm, n, local_dim))
    global_r = jnp.reshape(global_feature, (bm, global_dim))
    b2d = jnp.reshape(b, (1, fuse_dim))

    tb, tn, padded_bm, padded_n = _pick_tiles(bm, n)
    if padded_bm != bm or padded_n != n:
        local_r = jnp.pad(local_r,
                          ((0, padded_bm - bm), (0, padded_n - n), (0, 0)))
    if padded_bm != bm:
        global_r = jnp.pad(global_r, ((0, padded_bm - bm), (0, 0)))

    grid = (padded_bm // tb, padded_n // tn)

    out = pl.pallas_call(
        functools.partial(_fuse_kernel, compute_dtype=compute_dtype),
        out_shape=jax.ShapeDtypeStruct((padded_bm, padded_n, fuse_dim),
                                       out_dtype),
        grid_spec=pltpu.PrefetchScalarGridSpec(
            num_scalar_prefetch=0,
            grid=grid,
            in_specs=[
                pl.BlockSpec((tb, tn, local_dim), lambda i, j: (i, j, 0)),
                pl.BlockSpec((tb, global_dim), lambda i, j: (i, 0)),
                pl.BlockSpec((local_dim, fuse_dim), lambda i, j: (0, 0)),
                pl.BlockSpec((global_dim, fuse_dim), lambda i, j: (0, 0)),
                pl.BlockSpec((1, fuse_dim), lambda i, j: (0, 0)),
            ],
            out_specs=pl.BlockSpec((tb, tn, fuse_dim), lambda i, j: (i, j, 0)),
        ),
        compiler_params=pltpu.CompilerParams(
            dimension_semantics=("parallel", "parallel"),
            vmem_limit_bytes=48 * 1024 * 1024,   # safe on v7x's 64 MiB VMEM
        ),
    )(local_r, global_r, wl, wg, b2d)

    if padded_bm != bm or padded_n != n:
        out = out[:bm, :n, :]
    return out


# ---------------------------------------------------------------------------
# Module
# ---------------------------------------------------------------------------
class MultiFeatureFusionPallas:
    def __init__(self, key, local_dim=128, global_dim=256, fuse_dim=128,
                 fusion_layer_idxs=(1, 3, 7), compute_dtype=None,
                 out_dtype=None):
        self.local_dim = local_dim
        self.global_dim = global_dim
        self.fuse_dim = fuse_dim
        self.fusion_layer_idxs = tuple(fusion_layer_idxs)
        self.compute_dtype = compute_dtype
        self.out_dtype = out_dtype
        in_dim = local_dim + global_dim
        # Deterministic param init (Kaiming-uniform-ish bound, like nn.Linear).
        bound = 1.0 / np.sqrt(in_dim)
        self.params = []
        for _ in self.fusion_layer_idxs:
            key, kw, kb = jax.random.split(key, 3)
            w = jax.random.uniform(kw, (fuse_dim, in_dim), jnp.float32,
                                   minval=-bound, maxval=bound)
            b = jax.random.uniform(kb, (fuse_dim,), jnp.float32,
                                   minval=-bound, maxval=bound)
            # Pre-split + pre-transpose once at init (no per-call XLA transpose).
            wl = jnp.transpose(w[:, :local_dim])   # (Dl, Df)
            wg = jnp.transpose(w[:, local_dim:])   # (Dg, Df)
            self.params.append((w, b, wl, wg))

    def __call__(self, local_features, global_features):
        intermediate = []
        for idx, (w, b, wl, wg) in zip(self.fusion_layer_idxs, self.params):
            fused = feature_fuse_pallas(
                local_features[idx], global_features[idx], wl, wg, b,
                compute_dtype=self.compute_dtype, out_dtype=self.out_dtype)
            intermediate.append(fused)
        return intermediate


# ---------------------------------------------------------------------------
# Pure-JAX reference (mirrors the PyTorch ops exactly) + test
# ---------------------------------------------------------------------------
def _reference_fuse(local_feature, global_feature, w, b, local_dim, fuse_dim):
    B, m, Dg = global_feature.shape
    _, n, _ = local_feature.shape
    loc = jnp.reshape(local_feature, (B, m, n, local_dim))
    glb = jnp.broadcast_to(global_feature[:, :, None, :], (B, m, n, Dg))
    cat = jnp.concatenate([loc, glb], axis=3)
    out = jnp.maximum(jnp.einsum("bmnc,fc->bmnf", cat, w) + b, 0.0)
    return jnp.reshape(out, (B * m, n, fuse_dim))


if __name__ == "__main__":
    key = jax.random.PRNGKey(0)

    # Small-but-aligned shapes (module defaults for the feature dims).
    local_dim, global_dim, fuse_dim = 128, 256, 128
    B, m, n = 2, 2, 8
    num_layers = 8  # list must cover index 7

    key, kmod = jax.random.split(key)
    model = MultiFeatureFusionPallas(kmod, local_dim, global_dim, fuse_dim,
                                     fusion_layer_idxs=[1, 3, 7])

    local_features = []
    global_features = []
    for _ in range(num_layers):
        key, kl, kg = jax.random.split(key, 3)
        # local_features[idx]: (B, n, m*local_dim) -> reshaped to (B, m, n, local_dim)
        local_features.append(
            jax.random.normal(kl, (B, n, m * local_dim), jnp.float32))
        # global_features[idx]: (B, m, global_dim)
        global_features.append(
            jax.random.normal(kg, (B, m, global_dim), jnp.float32))

    outs = model(local_features, global_features)
    outs = [jax.block_until_ready(o) for o in outs]

    # Verify against the pure-JAX reference of the PyTorch forward.
    for (idx, (w, b, wl, wg)), o in zip(zip(model.fusion_layer_idxs, model.params),
                                        outs):
        ref = _reference_fuse(local_features[idx], global_features[idx], w, b,
                              local_dim, fuse_dim)
        assert o.shape == (B * m, n, fuse_dim), o.shape
        np.testing.assert_allclose(np.asarray(o), np.asarray(ref),
                                   rtol=1e-5, atol=1e-5)

    print("KERNEL_OK")
</pallas_src>

<mosaic_0001>
module attributes {stable_mosaic.version = 11 : i64} {
  func.func @_fuse_kernel(%arg0: i32, %arg1: i32, %arg2: memref<4x8x128xf32, #tpu.memory_space<vmem>>, %arg3: memref<4x256xf32, #tpu.memory_space<vmem>>, %arg4: memref<128x128xf32, #tpu.memory_space<vmem>>, %arg5: memref<256x128xf32, #tpu.memory_space<vmem>>, %arg6: memref<1x128xf32, #tpu.memory_space<vmem>>, %arg7: memref<4x8x128xf32, #tpu.memory_space<vmem>>) attributes {dimension_semantics = [#tpu.dimension_semantics<parallel>, #tpu.dimension_semantics<parallel>], iteration_bounds = array<i64: 1, 1>, scalar_prefetch = 0 : i64, scratch_operands = 0 : i64, tpu.core_type = #tpu.core_type<tc>, window_params = [{transform_indices = @transform_0, window_bounds = array<i64: 4, 8, 128>}, {transform_indices = @transform_1, window_bounds = array<i64: 4, 256>}, {pipeline_mode = #tpu.pipeline_mode<synchronous>, transform_indices = @transform_2, window_bounds = array<i64: 128, 128>}, {pipeline_mode = #tpu.pipeline_mode<synchronous>, transform_indices = @transform_3, window_bounds = array<i64: 256, 128>}, {pipeline_mode = #tpu.pipeline_mode<synchronous>, transform_indices = @transform_4, window_bounds = array<i64: 1, 128>}, {transform_indices = @transform_5, window_bounds = array<i64: 4, 8, 128>}]} {
    %c0 = arith.constant 0 : index
    %c0_0 = arith.constant 0 : index
    %c0_1 = arith.constant 0 : index
    %0 = vector.load %arg2[%c0, %c0_0, %c0_1] : memref<4x8x128xf32, #tpu.memory_space<vmem>>, vector<4x8x128xf32>
    %c0_2 = arith.constant 0 : index
    %c0_3 = arith.constant 0 : index
    %1 = vector.load %arg3[%c0_2, %c0_3] : memref<4x256xf32, #tpu.memory_space<vmem>>, vector<4x256xf32>
    %c0_4 = arith.constant 0 : index
    %c0_5 = arith.constant 0 : index
    %2 = vector.load %arg4[%c0_4, %c0_5] : memref<128x128xf32, #tpu.memory_space<vmem>>, vector<128x128xf32>
    %c0_6 = arith.constant 0 : index
    %c0_7 = arith.constant 0 : index
    %3 = vector.load %arg5[%c0_6, %c0_7] : memref<256x128xf32, #tpu.memory_space<vmem>>, vector<256x128xf32>
    %4 = vector.shape_cast %0 : vector<4x8x128xf32> to vector<32x128xf32>
    %cst = arith.constant dense<0.000000e+00> : vector<32x128xf32>
    %5 = tpu.matmul %4, %2, %cst {dimension_numbers = #tpu.dot_dimension_numbers<[1], [0], [0], [1], [0, 0, 1, 1], [], []>} : vector<32x128xf32>, vector<128x128xf32>, vector<32x128xf32> -> vector<32x128xf32>
    %6 = vector.shape_cast %5 : vector<32x128xf32> to vector<4x8x128xf32>
    %cst_8 = arith.constant dense<0.000000e+00> : vector<4x128xf32>
    %7 = tpu.matmul %1, %3, %cst_8 {dimension_numbers = #tpu.dot_dimension_numbers<[1], [0], [0], [1], [0, 0, 1, 1], [], []>} : vector<4x256xf32>, vector<256x128xf32>, vector<4x128xf32> -> vector<4x128xf32>
    %c0_9 = arith.constant 0 : index
    %c0_10 = arith.constant 0 : index
    %8 = vector.load %arg6[%c0_9, %c0_10] : memref<1x128xf32, #tpu.memory_space<vmem>>, vector<1x128xf32>
    %9 = vector.broadcast %8 : vector<1x128xf32> to vector<4x128xf32>
    %10 = arith.addf %7, %9 : vector<4x128xf32>
    %11 = vector.shape_cast %10 : vector<4x128xf32> to vector<4x1x128xf32>
    %12 = vector.broadcast %11 : vector<4x1x128xf32> to vector<4x8x128xf32>
    %13 = arith.addf %6, %12 : vector<4x8x128xf32>
    %cst_11 = arith.constant 0.000000e+00 : f32
    %14 = vector.broadcast %cst_11 : f32 to vector<4x8x128xf32>
    %15 = arith.maximumf %13, %14 : vector<4x8x128xf32>
    %c0_12 = arith.constant 0 : index
    %c0_13 = arith.constant 0 : index
    %c0_14 = arith.constant 0 : index
    %16 = vector.load %arg7[%c0_12, %c0_13, %c0_14] : memref<4x8x128xf32, #tpu.memory_space<vmem>>, vector<4x8x128xf32>
    tpu.vector_store %arg7[%c0_12, %c0_13, %c0_14], %15 {strides = array<i32>} : memref<4x8x128xf32, #tpu.memory_space<vmem>>, vector<4x8x128xf32>,
    return
  }
  func.func @transform_0(%arg0: i32, %arg1: i32) -> (i32, i32, i32) {
    %c0_i32 = arith.constant 0 : i32
    %c0_i32_0 = arith.constant 0 : i32
    return %arg0, %arg1, %c0_i32 : i32, i32, i32
  }
  func.func @transform_1(%arg0: i32, %arg1: i32) -> (i32, i32) {
    %c0_i32 = arith.constant 0 : i32
    %c0_i32_0 = arith.constant 0 : i32
    return %arg0, %c0_i32 : i32, i32
  }
  func.func @transform_2(%arg0: i32, %arg1: i32) -> (i32, i32) {
    %c0_i32 = arith.constant 0 : i32
    %c0_i32_0 = arith.constant 0 : i32
    %c0_i32_1 = arith.constant 0 : i32
    return %c0_i32, %c0_i32_0 : i32, i32
  }
  func.func @transform_3(%arg0: i32, %arg1: i32) -> (i32, i32) {
    %c0_i32 = arith.constant 0 : i32
    %c0_i32_0 = arith.constant 0 : i32
    %c0_i32_1 = arith.constant 0 : i32
    return %c0_i32, %c0_i32_0 : i32, i32
  }
  func.func @transform_4(%arg0: i32, %arg1: i32) -> (i32, i32) {
    %c0_i32 = arith.constant 0 : i32
    %c0_i32_0 = arith.constant 0 : i32
    %c0_i32_1 = arith.constant 0 : i32
    return %c0_i32, %c0_i32_0 : i32, i32
  }
  func.func @transform_5(%arg0: i32, %arg1: i32) -> (i32, i32, i32) {
    %c0_i32 = arith.constant 0 : i32
    %c0_i32_0 = arith.constant 0 : i32
    return %arg0, %arg1, %c0_i32 : i32, i32, i32
  }
}

</mosaic_0001>

<bundles_post_ra>
// kernel: feature_fuse_pallas.1
= control target key start
LH: loop header
LB: loop body
LE: loop exit
PB: predicated region body
PF: predicated region fallthrough
CT: control target
= control target key end

     0   :  { %10 = vsyncpa [#allocation3], 0  ;;  %s400_s0 = inlined_call_operand.vmem [shape: f32[4,8,128], index: 0, kind: input, shape index: {}]   ;;  %s401_s1 = inlined_call_operand.vmem [shape: f32[4,256], index: 1, kind: input, shape index: {}]   ;;  %s402_s2 = inlined_call_operand.hbm [shape: f32[128,128], index: 2, kind: input, shape index: {}]   ;;  %s403_s3 = inlined_call_operand.hbm [shape: f32[256,128], index: 3, kind: input, shape index: {}]   ;;  %s404_s4 = inlined_call_operand.vmem [shape: f32[1,128], index: 4, kind: input, shape index: {}]   ;;  %s405_s5 = inlined_call_operand.hbm [shape: f32[4,8,128], index: 5, kind: output, shape index: {}]  }
   0x1   :  { %11 = vsyncpa [#allocation6], 0 }
   0x2   :  { %12 = vsyncpa [#allocation4], 0  ;;  %s21_s20 = sshll.u32 %s402_s2, 4  ;;  %s329_s21 = smov [#allocation2]   ;;  %s22_s20 = int_to_ptr.hbm [resolvable:$true] %s21_s20 }
   0x3   :  { %s23_s22 = sshll.u32 %s329_s21, 4  ;;  %s34_s25 = sshll.u32 %s403_s3, 4  ;;  %s24_s22 = int_to_ptr.vmem [resolvable:$true] %s23_s22  ;;  %s35_s25 = int_to_ptr.hbm [resolvable:$true] %s34_s25 }
   0x4   :  { %s330_s26 = smov 128   ;;  %s331_s27 = smov 8  }
   0x5   :  { %29 = dma.hbm_to_vmem [thread:$0]  %s22_s20, 2048, %s24_s22, [#allocation3], %s330_s26, %s330_s26, %s331_s27  }
   0x6   :  { %s332_s28 = smov [#allocation5]  }
   0x7   :  { %s36_s29 = sshll.u32 %s332_s28, 4  ;;  %s37_s29 = int_to_ptr.vmem [resolvable:$true] %s36_s29 }
   0x8   :  { %42 = dma.hbm_to_vmem [thread:$0]  %s35_s25, 4096, %s37_s29, [#allocation6], %s330_s26, %s330_s26, %s331_s27  }
   0x9   :  { %323 = dma.done.wait [#allocation3], 2048  }
   0xa   :  { %324 = vsyncadd [#allocation3], 4294965248 }
   0xb   :  { %325 = dma.done.wait [#allocation6], 4096  }
   0xc   :  { %326 = vsyncadd [#allocation6], 4294963200  ;;  %v73_v0 = vld [vmem:[#allocation2 + $0x78] sm:$0xff]  ;;  %v72_v2 = vld [vmem:[#allocation2 + $0x70] sm:$0xff]  ;;  %s215_s16 = sshll.u32 %s405_s5, 4  ;;  %s216_s16 = int_to_ptr.hbm [resolvable:$true] %s215_s16 }
   0xd   :  { %v105_v1 = vld [vmem:[#allocation5 + $0xf8] sm:$0xff]  ;;  %229 = vmatpush.msra.mxu3 %v73_v0  ;;  %v104_v3 = vld [vmem:[#allocation5 + $0xf0] sm:$0xff]  ;;  %v71_v5 = vld [vmem:[#allocation2 + $0x68] sm:$0xff]  ;;  %106 = vmatpush.msra.mxu0 %v73_v0 }
   0xe   :  { %165 = vmatpush.msra.mxu2 %v105_v1  ;;  %v89_v4 = vld [vmem:[#allocation5 + $0x78] sm:$0xff]  ;;  %v103_v6 = vld [vmem:[#allocation5 + $0xe8] sm:$0xff]  ;;  %v88_v7 = vld [vmem:[#allocation5 + $0x70] sm:$0xff] }
   0xf   :  { %145 = vmatpush.msra.mxu1 %v89_v4  ;;  %230 = vmatpush.msra.mxu3 %v72_v2  ;;  %v87_v8 = vld [vmem:[#allocation5 + $0x68] sm:$0xff]  ;;  %v70_v9 = vld [vmem:[#allocation2 + $0x60] sm:$0xff]  ;;  %v69_v12 = vld [vmem:[#allocation2 + $0x58] sm:$0xff] }
  0x10   :  { %166 = vmatpush.msra.mxu2 %v104_v3  ;;  %v102_v10 = vld [vmem:[#allocation5 + $0xe0] sm:$0xff]  ;;  %107 = vmatpush.msra.mxu0 %v72_v2  ;;  %v101_v13 = vld [vmem:[#allocation5 + $0xd8] sm:$0xff]  ;;  %v68_v15 = vld [vmem:[#allocation2 + $0x50] sm:$0xff] }
  0x11   :  { %146 = vmatpush.msra.mxu1 %v88_v7  ;;  %231 = vmatpush.msra.mxu3 %v71_v5  ;;  %v86_v11 = vld [vmem:[#allocation5 + $0x60] sm:$0xff]  ;;  %v85_v14 = vld [vmem:[#allocation5 + $0x58] sm:$0xff]  ;;  %v100_v16 = vld [vmem:[#allocation5 + $0xd0] sm:$0xff] }
  0x12   :  { %167 = vmatpush.msra.mxu2 %v103_v6  ;;  %108 = vmatpush.msra.mxu0 %v71_v5  ;;  %v84_v17 = vld [vmem:[#allocation5 + $0x50] sm:$0xff]  ;;  %v67_v18 = vld [vmem:[#allocation2 + $0x48] sm:$0xff]  ;;  %v66_v21 = vld [vmem:[#allocation2 + $0x40] sm:$0xff] }
  0x13   :  { %147 = vmatpush.msra.mxu1 %v87_v8  ;;  %232 = vmatpush.msra.mxu3 %v70_v9  ;;  %v99_v19 = vld [vmem:[#allocation5 + $0xc8] sm:$0xff]  ;;  %v98_v22 = vld [vmem:[#allocation5 + $0xc0] sm:$0xff]  ;;  %v65_v24 = vld [vmem:[#allocation2 + $0x38] sm:$0xff] }
  0x14   :  { %168 = vmatpush.msra.mxu2 %v102_v10  ;;  %109 = vmatpush.msra.mxu0 %v70_v9  ;;  %v83_v20 = vld [vmem:[#allocation5 + $0x48] sm:$0xff]  ;;  %v82_v23 = vld [vmem:[#allocation5 + $0x40] sm:$0xff]  ;;  %v97_v25 = vld [vmem:[#allocation5 + $0xb8] sm:$0xff] }
  0x15   :  { %148 = vmatpush.msra.mxu1 %v86_v11  ;;  %233 = vmatpush.msra.mxu3 %v69_v12  ;;  %v81_v26 = vld [vmem:[#allocation5 + $0x38] sm:$0xff]  ;;  %v64_v28 = vld [vmem:[#allocation2 + $0x30] sm:$0xff]  ;;  %v63_v31 = vld [vmem:[#allocation2 + $0x28] sm:$0xff] }
  0x16   :  { %169 = vmatpush.msra.mxu2 %v101_v13  ;;  %110 = vmatpush.msra.mxu0 %v69_v12  ;;  %v57_v27 = vld [vmem:[%s401_s1] sm:$0xff]  ;;  %v96_v29 = vld [vmem:[#allocation5 + $0xb0] sm:$0xff]  ;;  %v95_v32 = vld [vmem:[#allocation5 + $0xa8] sm:$0xff] }
  0x17   :  { %149 = vmatpush.msra.mxu1 %v85_v14  ;;  %234 = vmatpush.msra.mxu3 %v68_v15  ;;  %140 = vst [vmem:[#allocation1] ss:$2 sm:$0xff] %v57_v27  ;;  %v80_v30 = vld [vmem:[#allocation5 + $0x30] sm:$0xff]  ;;  %v79_v33 = vld [vmem:[#allocation5 + $0x28] sm:$0xff]  ;;  %v62_v34 = vld [vmem:[#allocation2 + $0x20] sm:$0xff] }
  0x18   :  { %170 = vmatpush.msra.mxu2 %v100_v16  ;;  %111 = vmatpush.msra.mxu0 %v68_v15  ;;  %v94_v35 = vld [vmem:[#allocation5 + $0xa0] sm:$0xff]  ;;  %v61_v37 = vld [vmem:[#allocation2 + $0x18] sm:$0xff]  ;;  %v60_v40 = vld [vmem:[#allocation2 + $0x10] sm:$0xff] }
  0x19   :  { %150 = vmatpush.msra.mxu1 %v84_v17  ;;  %235 = vmatpush.msra.mxu3 %v67_v18  ;;  %v78_v36 = vld [vmem:[#allocation5 + $0x20] sm:$0xff]  ;;  %v93_v38 = vld [vmem:[#allocation5 + $0x98] sm:$0xff]  ;;  %v92_v41 = vld [vmem:[#allocation5 + $0x90] sm:$0xff] }
  0x1a   :  { %171 = vmatpush.msra.mxu2 %v99_v19  ;;  %112 = vmatpush.msra.mxu0 %v67_v18  ;;  %v77_v39 = vld [vmem:[#allocation5 + $0x18] sm:$0xff]  ;;  %v76_v42 = vld [vmem:[#allocation5 + $0x10] sm:$0xff]  ;;  %v59_v43 = vld [vmem:[#allocation2 + $0x8] sm:$0xff] }
  0x1b   :  { %151 = vmatpush.msra.mxu1 %v83_v20  ;;  %236 = vmatpush.msra.mxu3 %v66_v21  ;;  %v91_v44 = vld [vmem:[#allocation5 + $0x88] sm:$0xff]  ;;  %v58_v46 = vld [vmem:[#allocation2] sm:$0xff]  ;;  %v53_v52 = vld [vmem:[%s400_s0] sm:$0xff] }
  0x1c   :  { %172 = vmatpush.msra.mxu2 %v98_v22  ;;  %113 = vmatpush.msra.mxu0 %v66_v21  ;;  %v75_v45 = vld [vmem:[#allocation5 + $0x8] sm:$0xff]  ;;  %v90_v47 = vld [vmem:[#allocation5 + $0x80] sm:$0xff]  ;;  %v56_v53 = vld [vmem:[%s400_s0 + $0x18] sm:$0xff] }
  0x1d   :  { %152 = vmatpush.msra.mxu1 %v82_v23  ;;  %237 = vmatpush.msra.mxu3 %v65_v24  ;;  %v55_v48 = vld [vmem:[%s400_s0 + $0x10] sm:$0xff]  ;;  %v74_v50 = vld [vmem:[#allocation5] sm:$0xff]  ;;  %v250_v55 = vld [vmem:[%s404_s4] ss:$0 sm:$0xff] }
  0x1e   :  { %173 = vmatpush.msra.mxu2 %v97_v25  ;;  %114 = vmatpush.msra.mxu0 %v65_v24  ;;  %v142_v49 = vld.sshfl [vmem:[#allocation1 + $0x8] sm:$0xff pattern:$0x75316420]  ;;  %v141_v51 = vld.sshfl [vmem:[#allocation1] sm:$0xff pattern:$0x75316420] }
  0x1f   :  { %153 = vmatpush.msra.mxu1 %v81_v26  ;;  %238 = vmatpush.msra.mxu3 %v64_v28  ;;  %v54_v54 = vld [vmem:[%s400_s0 + $0x8] sm:$0xff]  ;;  %s333_s0 = smov [#allocation7]  }
  0x20   :  { %174 = vmatpush.msra.mxu2 %v96_v29  ;;  %115 = vmatpush.msra.mxu0 %v64_v28  ;;  %s213_s4 = sshll.u32 %s333_s0, 4  ;;  %s214_s4 = int_to_ptr.vmem [resolvable:$true] %s213_s4 }
  0x21   :  { %154 = vmatpush.msra.mxu1 %v80_v30  ;;  %239 = vmatpush.msra.mxu3 %v63_v31 }
  0x22   :  { %175 = vmatpush.msra.mxu2 %v95_v32  ;;  %116 = vmatpush.msra.mxu0 %v63_v31 }
  0x23   :  { %155 = vmatpush.msra.mxu1 %v79_v33  ;;  %240 = vmatpush.msra.mxu3 %v62_v34 }
  0x24   :  { %176 = vmatpush.msra.mxu2 %v94_v35  ;;  %117 = vmatpush.msra.mxu0 %v62_v34 }
  0x25   :  { %156 = vmatpush.msra.mxu1 %v78_v36  ;;  %241 = vmatpush.msra.mxu3 %v61_v37 }
  0x26   :  { %177 = vmatpush.msra.mxu2 %v93_v38  ;;  %118 = vmatpush.msra.mxu0 %v61_v37 }
  0x27   :  { %157 = vmatpush.msra.mxu1 %v77_v39  ;;  %242 = vmatpush.msra.mxu3 %v60_v40 }
  0x28   :  { %178 = vmatpush.msra.mxu2 %v92_v41  ;;  %119 = vmatpush.msra.mxu0 %v60_v40 }
  0x29   :  { %158 = vmatpush.msra.mxu1 %v76_v42  ;;  %243 = vmatpush.msra.mxu3 %v59_v43 }
  0x2a   :  { %179 = vmatpush.msra.mxu2 %v91_v44  ;;  %120 = vmatpush.msra.mxu0 %v59_v43 }
  0x2b   :  { %159 = vmatpush.msra.mxu1 %v75_v45  ;;  %244 = vmatpush.msra.mxu3 %v58_v46 }
  0x2c   :  { %180 = vmatpush.msra.mxu2 %v90_v47  ;;  %128 = vmatmul.f32.vlgmr.msra.gmra.mxu3 %v55_v48 }
  0x2d   :  { %181 = vmatmul.f32.vlgmr.msra.gmra.mxu2 %v142_v49  ;;  %160 = vmatpush.msra.mxu1 %v74_v50 }
  0x2e   :  { %121 = vmatpush.msra.mxu0 %v58_v46  ;;  %161 = vmatmul.f32.vlgmr.msra.gmra.mxu1 %v141_v51 }
  0x2f   :  { %122 = vmatmul.f32.vlgmr.msra.gmra.mxu0 %v53_v52 }
  0x34   :  { %131 = vmatmul.f32.gmra.mxu3 %v56_v53 }
  0x37   :  { %125 = vmatmul.f32.gmra.mxu0 %v54_v54 }
  0xab   :  { %v162_v56 = vpop.f32.mrf.mxu1 }
  0xac   :  { %v123_v57 = vpop.f32.mrf.mxu0  ;;  %v163_v58 = vadd.f32 %v250_v55, %v162_v56 }
  0xaf   :  { %v129_v59 = vpop.f32.mrf.mxu3 }
  0xb0   :  { %v182_v60 = vpop.f32.mrf.mxu2 }
  0xb1   :  { %v183_v61 = vadd.f32 %v182_v60, %v163_v58 }
  0xb3   :  { %v187_v62 = vrot.slane %v183_v61, 2  ;;  %v189_v63 = vperm.slane %v183_v61, 0  ;;  %v186_v0 = vrot.slane %v183_v61, 1  ;;  %v188_v1 = vrot.slane %v183_v61, 3 }
  0xb4   :  { %v126_v2 = vpop.f32.mrf.mxu0 }
  0xb5   :  { %v191_v3 = vperm.slane %v187_v62, 0  ;;  %v197_v4 = vadd.f32 %v189_v63, %v123_v57  ;;  %v190_v5 = vperm.slane %v186_v0, 0  ;;  %v192_v6 = vperm.slane %v188_v1, 0 }
  0xb7   :  { %v199_v7 = vadd.f32 %v191_v3, %v129_v59  ;;  %v201_v8 = vmax.f32 %v197_v4, 0.0  ;;  %v198_v9 = vadd.f32 %v190_v5, %v126_v2  ;;  %v132_v10 = vpop.f32.mrf.mxu3 }
  0xb8   :  { %v200_v13 = vadd.f32 %v192_v6, %v132_v10 }
  0xb9   :  { %v203_v11 = vmax.f32 %v199_v7, 0.0  ;;  %205 = vst [vmem:[#allocation7] sm:$0xff] %v201_v8  ;;  %v202_v12 = vmax.f32 %v198_v9, 0.0 }
  0xba   :  { %v204_v14 = vmax.f32 %v200_v13, 0.0 }
  0xbb   :  { %207 = vst [vmem:[#allocation7 + $0x10] sm:$0xff] %v203_v11 }
  0xbc   :  { %206 = vst [vmem:[#allocation7 + $0x8] sm:$0xff] %v202_v12 }
  0xbd   :  { %208 = vst [vmem:[#allocation7 + $0x18] sm:$0xff] %v204_v14 }
  0xbe   :  { %221 = dma.vmem_to_hbm [thread:$0]  %s214_s4, 512, %s216_s16, [#allocation4], %s330_s26, %s330_s26, %s331_s27  }
  0xbf   :  { %327 = dma.done.wait [#allocation4], 512  }
  0xc0   :  { %328 = vsyncadd [#allocation4], 4294966784 }
  0xc1   :  { %226 = vsyncpa [#allocation3], 1 }
  0xc2   :  { %227 = vsyncpa [#allocation6], 1 }
  0xc3   :  { %228 = vsyncpa [#allocation4], 1 }

</bundles_post_ra>
